<compile_context>
chip_gen: v7x
topology: tpu7x:2x2x1
jax: 0.10.0
libtpu: 0.0.40
codegen_flags: <defaults>
</compile_context>

<pallas_src>
import jax
import jax.numpy as jnp
from jax.experimental import pallas as pl
from jax.experimental.pallas import tpu as pltpu


def _head_kernel(x_ref, w_ref, b_ref, o_ref):
    """Fused CLS-GELU -> (eval) dropout -> Linear(H,1) -> sigmoid, one batch tile.

    x_ref: [TB, H] VMEM  — CLS-token embeddings for this batch tile (only the
                           first H columns of the [B, S*H] view are DMA'd).
    w_ref: [1, H]  VMEM  — linear weight, f32 (same block every step -> resident).
    b_ref: [1]     SMEM  — linear bias scalar.
    o_ref: [1, TB] VMEM  — lane-dense probabilities (batch on the lane axis).
    """
    x = x_ref[...].astype(jnp.float32)                        # [TB, H]

    # tanh-approx GELU (== torch nn.GELU(approximate='tanh')):
    #   0.5 * x * (1 + tanh(sqrt(2/pi) * (x + 0.044715 * x^3)))
    # tanh goes to the EUP slot; the remaining VPU chain is a handful of ops.
    c0 = jnp.float32(0.7978845608028654)                      # sqrt(2/pi)
    c1 = jnp.float32(0.044715)
    g = 0.5 * x * (1.0 + jnp.tanh(c0 * (x + c1 * x * x * x)))

    # TODO(synk): training-mode dropout would need pltpu.prng_seed +
    # pltpu.stateful_bernoulli; nn.Dropout is identity in eval/inference mode.

    # MXU contraction over H with the RHS transposed: [1,H] x [TB,H]^T -> [1,TB].
    # Batch lands directly on the lane axis, so the store below is a lane-dense
    # vst row instead of a [TB,1] column of masked partial stores.  Default
    # precision -> single-pass MXU (no HIGHEST multi-pass emulation).
    logits = jax.lax.dot_general(
        w_ref[...], g,
        dimension_numbers=(((1,), (1,)), ((), ())),
        preferred_element_type=jnp.float32,
    )                                                         # [1, TB]

    o_ref[...] = jax.nn.sigmoid(logits + b_ref[0])


def _round_up(n, m):
    return ((n + m - 1) // m) * m


def _choose_batch_tile(B, H):
    """Pick the batch tile size TB.

    * B <= 128: single exact block (TB == B) -> no padding, no block overhang.
    * larger B: TB is a multiple of 128 (lane-dense output stores, sublane
      aligned input blocks), capped at 512 and by VMEM, chosen so large B
      yields >= 8 grid steps (pipelining + both v7x TensorCores busy).
    """
    if B <= 128:
        return B
    tb = min(512, max(128, _round_up(pl.cdiv(B, 8), 128)))
    # Keep the double-buffered f32 [TB, H] input under ~16 MiB of scoped VMEM.
    cap = max(128, (((8 << 20) // (4 * H)) // 128) * 128)
    return min(tb, cap)


def classifier_head(x_bsh, weight, bias):
    """Head of `classifier.forward` downstream of the BERT encoder.

    x_bsh:  [B, S, H] encoder output (HF layout, f32 or bf16). Only seq
            position 0 (CLS) is read — the slice is fused into the BlockSpec.
    weight: [1, H] nn.Linear(H, 1) weight.
    bias:   1-element array, nn.Linear(H, 1) bias.

    Returns [B] probabilities (== torch sigmoid(linear(gelu(cls)))[:, 0]).
    """
    B, S, H = x_bsh.shape
    if H % 128 != 0:
        raise ValueError(
            "classifier_head requires hidden size H to be a multiple of 128 "
            "(true for bert-base/scibert/sapbert=768, biolinkbert-large=1024, "
            f"albert-xxlarge=4096); got H={H}."
        )

    TB = _choose_batch_tile(B, H)
    nb = pl.cdiv(B, TB)
    B_pad = nb * TB  # output is allocated padded; padded lanes sliced off below

    # Metadata-only reshape: CLS token == first H columns of each S*H row, so a
    # (TB, H) block at column-block 0 reads exactly the CLS embeddings with one
    # clean strided DMA per tile (row length H*itemsize, stride S*H*itemsize).
    x_flat = x_bsh.reshape(B, S * H)

    w_row = jnp.asarray(weight, dtype=jnp.float32).reshape(1, H)  # pre-cast once
    bias_flat = jnp.asarray(bias, dtype=jnp.float32).reshape(1)

    itemsize = jnp.dtype(x_bsh.dtype).itemsize
    cost = pl.CostEstimate(
        flops=int(10 * B_pad * H),                  # gelu poly + matvec
        transcendentals=int(B_pad * H + B_pad),     # tanh per element + sigmoid
        bytes_accessed=int(B_pad * H * itemsize + H * 4 + B_pad * 4 + 4),
    )

    out = pl.pallas_call(
        _head_kernel,
        out_shape=jax.ShapeDtypeStruct((1, B_pad), jnp.float32),
        grid=(nb,),
        in_specs=[
            # CLS extraction fused into the spec: rows = batch tile, cols = the
            # first H of the flattened S*H axis.  Only B*H elements are DMA'd.
            pl.BlockSpec((TB, H), lambda i: (i, 0)),
            # Weight: constant block index -> DMA'd once, stays resident.
            pl.BlockSpec((1, H), lambda i: (0, 0)),
            # Bias scalar: whole 1-D array in SMEM.
            pl.BlockSpec(memory_space=pltpu.MemorySpace.SMEM),
        ],
        # Lane-dense output: batch on the lane axis, unmasked vst per tile.
        out_specs=pl.BlockSpec((1, TB), lambda i: (0, i)),
        compiler_params=pltpu.CompilerParams(
            dimension_semantics=("parallel",),  # batch tiles shard across v7x TCs
            vmem_limit_bytes=32 * 1024 * 1024,
        ),
        cost_estimate=cost,
    )(x_flat, w_row, bias_flat)

    return out[0, :B]                                         # [B]


if __name__ == "__main__":
    key = jax.random.PRNGKey(0)
    B, S, H = 8, 8, 128   # batch, seq, hidden (input_size = H)

    kx, kw, kb = jax.random.split(key, 3)

    # Synthetic "BERT output" embeddings.
    x = jax.random.normal(kx, (B, S, H), dtype=jnp.float32)

    # Deterministic nn.Linear(H, 1) init: U(-1/sqrt(H), 1/sqrt(H)).
    bound = 1.0 / jnp.sqrt(jnp.float32(H))
    weight = jax.random.uniform(kw, (1, H), dtype=jnp.float32,
                                minval=-bound, maxval=bound)
    bias = jax.random.uniform(kb, (1,), dtype=jnp.float32,
                              minval=-bound, maxval=bound)

    y = classifier_head(x, weight, bias)
    jax.block_until_ready(y)

    # Reference check in plain JAX (exact-erf GELU, f32, same as the PyTorch
    # head).  Tolerance is deliberately loose: the kernel uses tanh-approx GELU
    # and single-pass MXU precision (expected numerics change for a sigmoid
    # classifier head, not a kernel bug).
    x_cls = x[:, 0, :]
    g = 0.5 * x_cls * (1.0 + jax.lax.erf(x_cls / jnp.sqrt(jnp.float32(2.0))))
    logits = jnp.einsum("bh,h->b", g, weight[0],
                        precision=jax.lax.Precision.HIGHEST) + bias[0]
    ref = jax.nn.sigmoid(logits)

    assert y.shape == (B,)
    assert jnp.allclose(y, ref, atol=1e-2, rtol=1e-2), (y, ref)

    print("KERNEL_OK")
</pallas_src>

<mosaic_0001>
module attributes {stable_mosaic.version = 11 : i64} {
  func.func @_head_kernel(%arg0: i32, %arg1: memref<8x128xf32, #tpu.memory_space<vmem>>, %arg2: memref<1x128xf32, #tpu.memory_space<vmem>>, %arg3: memref<1xf32, #tpu.memory_space<smem>>, %arg4: memref<1x8xf32, #tpu.memory_space<vmem>>) attributes {dimension_semantics = [#tpu.dimension_semantics<parallel>], iteration_bounds = array<i64: 1>, scalar_prefetch = 0 : i64, scratch_operands = 0 : i64, tpu.core_type = #tpu.core_type<tc>, window_params = [{transform_indices = @transform_0, window_bounds = array<i64: 8, 128>}, {pipeline_mode = #tpu.pipeline_mode<synchronous>, transform_indices = @transform_1, window_bounds = array<i64: 1, 128>}, {transform_indices = @transform_2, window_bounds = array<i64: 1>}, {transform_indices = @transform_3, window_bounds = array<i64: 1, 8>}]} {
    %c0 = arith.constant 0 : index
    %c0_0 = arith.constant 0 : index
    %0 = vector.load %arg1[%c0, %c0_0] : memref<8x128xf32, #tpu.memory_space<vmem>>, vector<8x128xf32>
    %cst = arith.constant 5.000000e-01 : f32
    %1 = vector.broadcast %cst : f32 to vector<8x128xf32>
    %2 = arith.mulf %1, %0 : vector<8x128xf32>
    %cst_1 = arith.constant 4.471500e-02 : f32
    %3 = vector.broadcast %cst_1 : f32 to vector<8x128xf32>
    %4 = arith.mulf %3, %0 : vector<8x128xf32>
    %5 = arith.mulf %4, %0 : vector<8x128xf32>
    %6 = arith.mulf %5, %0 : vector<8x128xf32>
    %7 = arith.addf %0, %6 : vector<8x128xf32>
    %cst_2 = arith.constant 0.797884583 : f32
    %8 = vector.broadcast %cst_2 : f32 to vector<8x128xf32>
    %9 = arith.mulf %8, %7 : vector<8x128xf32>
    %10 = math.tanh %9 : vector<8x128xf32>
    %cst_3 = arith.constant 1.000000e+00 : f32
    %11 = vector.broadcast %cst_3 : f32 to vector<8x128xf32>
    %12 = arith.addf %11, %10 : vector<8x128xf32>
    %13 = arith.mulf %2, %12 : vector<8x128xf32>
    %c0_4 = arith.constant 0 : index
    %c0_5 = arith.constant 0 : index
    %14 = vector.load %arg2[%c0_4, %c0_5] : memref<1x128xf32, #tpu.memory_space<vmem>>, vector<1x128xf32>
    %cst_6 = arith.constant dense<0.000000e+00> : vector<1x8xf32>
    %15 = tpu.matmul %14, %13, %cst_6 {dimension_numbers = #tpu.dot_dimension_numbers<[1], [1], [0], [0], [0, 0, 1, 0], [], []>} : vector<1x128xf32>, vector<8x128xf32>, vector<1x8xf32> -> vector<1x8xf32>
    %c0_7 = arith.constant 0 : index
    %16 = memref.load %arg3[%c0_7] : memref<1xf32, #tpu.memory_space<smem>>
    %17 = vector.broadcast %16 : f32 to vector<1x8xf32>
    %18 = arith.addf %15, %17 : vector<1x8xf32>
    %19 = arith.negf %18 : vector<1x8xf32>
    %20 = math.exp %19 : vector<1x8xf32>
    %cst_8 = arith.constant 1.000000e+00 : f32
    %21 = vector.broadcast %cst_8 : f32 to vector<1x8xf32>
    %22 = arith.addf %21, %20 : vector<1x8xf32>
    %23 = arith.divf %21, %22 : vector<1x8xf32>
    %c0_9 = arith.constant 0 : index
    %c0_10 = arith.constant 0 : index
    %24 = vector.load %arg4[%c0_9, %c0_10] : memref<1x8xf32, #tpu.memory_space<vmem>>, vector<1x8xf32>
    tpu.vector_store %arg4[%c0_9, %c0_10], %23 {strides = array<i32>} : memref<1x8xf32, #tpu.memory_space<vmem>>, vector<1x8xf32>,
    return
  }
  func.func @transform_0(%arg0: i32) -> (i32, i32) {
    %c0_i32 = arith.constant 0 : i32
    %c0_i32_0 = arith.constant 0 : i32
    return %arg0, %c0_i32 : i32, i32
  }
  func.func @transform_1(%arg0: i32) -> (i32, i32) {
    %c0_i32 = arith.constant 0 : i32
    %c0_i32_0 = arith.constant 0 : i32
    %c0_i32_1 = arith.constant 0 : i32
    return %c0_i32, %c0_i32_0 : i32, i32
  }
  func.func @transform_2(%arg0: i32) -> i32 {
    %c0_i32 = arith.constant 0 : i32
    %c0_i32_0 = arith.constant 0 : i32
    return %c0_i32 : i32
  }
  func.func @transform_3(%arg0: i32) -> (i32, i32) {
    %c0_i32 = arith.constant 0 : i32
    %c0_i32_0 = arith.constant 0 : i32
    return %c0_i32, %arg0 : i32, i32
  }
}

</mosaic_0001>

<bundles_post_ra>
// kernel: tpu_custom_call.1
= control target key start
LH: loop header
LB: loop body
LE: loop exit
PB: predicated region body
PF: predicated region fallthrough
CT: control target
= control target key end

     0   :  { %9 = vsyncpa [#allocation4], 0  ;;  %s257_s0 = inlined_call_operand.hbm [shape: f32[8,1024], index: 0, kind: input, shape index: {}]   ;;  %s258_s1 = inlined_call_operand.vmem [shape: f32[1,128], index: 1, kind: input, shape index: {}]   ;;  %s259_s2 = inlined_call_operand.<no memory space> [shape: f32[1], index: 2, kind: input, shape index: {}]   ;;  %s260_s3 = inlined_call_operand.hbm [shape: f32[1,8], index: 3, kind: output, shape index: {}]  }
   0x1   :  { %10 = vsyncpa [#allocation5], 0  ;;  %s200_s12 = smov [#allocation3]   ;;  %s152_s16 = scalar_lea.hbm %s257_s0, 128 }
   0x2   :  { %s17_s13 = sshll.u32 %s200_s12, 4  ;;  %p153_p0 = scmp.ne.s32.totalorder %s257_s0, %s152_s16  ;;  %s18_s13 = int_to_ptr.vmem [resolvable:$true] %s17_s13 }
   0x3   :  { %s154_s21 = scalar_lea.hbm %s257_s0, 1024  ;;  %p156_p2 = scmp.lt.u32.totalorder %s152_s16, %s257_s0 }
   0x4   :  { %p155_p1 = scmp.lt.u32.totalorder %s154_s21, %s152_s16 }
   0x6   :  { %p157_p3 = por %p156_p2, %p155_p1 }
   0x8   :  { %p158_p4 = pnand %p157_p3, %p153_p0 }
   0xa   :  { %161 = shalt.err (!%p158_p4)
}
   0xb   :  { %s162_s24 = scalar_lea.vmem %s18_s13, 128  ;;  %p167_p6 = scmp.lt.s32.totalorder %s18_s13, %s18_s13 }
   0xc   :  { %p163_p5 = scmp.ne.s32.totalorder %s18_s13, %s162_s24  ;;  %p168_p7 = scmp.lt.s32.totalorder %s162_s24, %s162_s24 }
   0xe   :  { %p169_p8 = por %p168_p7, %p167_p6 }
  0x10   :  { %p170_p9 = pnand %p169_p8, %p163_p5 }
  0x12   :  { %173 = shalt.err (!%p170_p9)
}
  0x13   :  { %20 = dma.hbm_to_vmem [thread:$0]  %s257_s0, 128, %s18_s13, [#allocation4]  }
  0x14   :  { %196 = dma.done.wait [#allocation4], 128  }
  0x15   :  { %197 = vsyncadd [#allocation4], 4294967168  ;;  %v201_v0 = vmov 0.0   ;;  %vm202_vm0 = vmmov 0   ;;  %v28_v1 = vld [vmem:[#allocation3] sm:$0xff]  ;;  %v40_v12 = vstv %s259_s2  ;;  %s203_s30 = smov [#allocation6]  }
  0x16   :  { %137 = vmatprep.subr.mxu0 %v201_v0  ;;  %139 = vmatprep.mubr.msk.f32.mxu0 %vm202_vm0, %v201_v0  ;;  %v30_v2 = vmul.f32 0.044715, %v28_v1  ;;  %v29_v7 = vmul.f32 0.5, %v28_v1  ;;  %v38_v11 = vld [vmem:[%s258_s1] sm:$0x1]  ;;  %s125_s4 = sshll.u32 %s203_s30, 4  ;;  %s126_s4 = int_to_ptr.vmem [resolvable:$true] %s125_s4 }
  0x17   :  { %vm117_vm1 = vcmask 57344   ;;  %s174_s1 = scalar_lea.vmem %s126_s4, 16  ;;  %s178_s5 = scalar_lea.vmem %s126_s4, 32 }
  0x18   :  { %v31_v3 = vmul.f32 %v30_v2, %v28_v1  ;;  %p175_p10 = scmp.ne.s32.totalorder %s126_s4, %s174_s1  ;;  %p179_p11 = scmp.lt.s32.totalorder %s126_s4, %s126_s4 }
  0x19   :  { %p180_p12 = scmp.lt.s32.totalorder %s178_s5, %s174_s1 }
  0x1a   :  { %v32_v4 = vmul.f32 %v31_v3, %v28_v1 }
  0x1b   :  { %p181_p13 = por %p180_p12, %p179_p11 }
  0x1c   :  { %v33_v5 = vadd.f32 %v32_v4, %v28_v1 }
  0x1d   :  { %p182_p0 = pnand %p181_p13, %p175_p10 }
  0x1e   :  { %v34_v6 = vmul.f32 0.7978846, %v33_v5 }
  0x20   :  { %146 = vtanh.f32 %v34_v6 }
  0x2a   :  { %v147_v8 = vpop.eup %146 }
  0x2b   :  { %v36_v9 = vadd.f32 1.0, %v147_v8 }
  0x2d   :  { %v37_v10 = vmul.f32 %v36_v9, %v29_v7 }
  0x2f   :  { %138 = vmatpush3.xpose.msra.mxu0 %v37_v10 }
  0x32   :  { %140 = vmatmul.mubr.f32.vlgmr.msra.gmra.mrb[0].mxu0 %v38_v11 }
 0x105   :  { %v107_v13 = vpop.f32.mrb[0].mxu0 }
 0x106   :  { %v108_v14 = vadd.f32 %v107_v13, %v40_v12  ;;  %v141_v15 = vpop.f32.mrb[1].mxu0 }
 0x108   :  { %v134_v16 = vmul.f32 -1.442695, %v108_v14 }
 0x10a   :  { %148 = vpow2.f32 %v134_v16 }
 0x114   :  { %v149_v17 = vpop.eup %148 }
 0x115   :  { %v114_v18 = vadd.f32 1.0, %v149_v17 }
 0x117   :  { %150 = vrcp.f32 %v114_v18 }
 0x121   :  { %v151_v19 = vpop.eup %150 }
 0x122   :  { %118 = vst.msk [vmem:[#allocation6] sm:$0x1] %vm117_vm1, %v151_v19 }
 0x123   :  { %185 = shalt.err (!%p182_p0)
}
 0x124   :  { %s186_s7 = scalar_lea.hbm %s260_s3, 16 }
 0x125   :  { %p187_p1 = scmp.ne.s32.totalorder %s260_s3, %s186_s7  ;;  %p190_p2 = scmp.lt.u32.totalorder %s186_s7, %s260_s3 }
 0x127   :  { %p192_p3 = pnand %p190_p2, %p187_p1 }
 0x129   :  { %195 = shalt.err (!%p192_p3)
}
 0x12a   :  { %128 = dma.vmem_to_hbm [thread:$0]  %s126_s4, 16, %s260_s3, [#allocation5]  }
 0x12b   :  { %198 = dma.done.wait [#allocation5], 16  }
 0x12c   :  { %199 = vsyncadd [#allocation5], 4294967280 }
 0x12d   :  { %132 = vsyncpa [#allocation4], 1 }
 0x12e   :  { %133 = vsyncpa [#allocation5], 1 }

</bundles_post_ra>
